<compile_context>
chip_gen: v7x
topology: tpu7x:2x2x1
jax: 0.10.0
libtpu: 0.0.40
codegen_flags: <defaults>
</compile_context>

<pallas_src>
import functools

import jax
import jax.numpy as jnp
from jax.experimental import pallas as pl
from jax.experimental.pallas import tpu as pltpu

EPS = 1e-5
_VMEM_LIMIT = 32 * 1024 * 1024        # explicit scoped-VMEM budget (safe on all gens)
_LANE_TILE_CAP = 2048                 # max lanes per tile
_TILE_BYTES_TARGET = 3 << 19          # ~1.5 MiB per f32 tile buffer


def _round_up(x, m):
    return ((x + m - 1) // m) * m


def _pick_lane_tile(hw_pad):
    """Largest multiple-of-128 divisor of hw_pad not exceeding _LANE_TILE_CAP."""
    m = hw_pad // 128
    best = 1
    for d in range(1, _LANE_TILE_CAP // 128 + 1):
        if m % d == 0:
            best = d
    return 128 * best


# --------------- pass 1: per-row sum & sum-of-squares -----------------------

def _stats_kernel(x_ref, sum_ref, sq_ref):
    # x_ref: (TR, TL); sum_ref / sq_ref: (TR, 1) accumulators resident over j.
    @pl.when(pl.program_id(1) == 0)
    def _():
        sum_ref[...] = jnp.zeros_like(sum_ref)
        sq_ref[...] = jnp.zeros_like(sq_ref)

    x = x_ref[...]
    sum_ref[...] += jnp.sum(x, axis=1, keepdims=True)
    sq_ref[...] += jnp.sum(x * x, axis=1, keepdims=True)


# --------------- tiny fold: stats + 1x1 conv + sigmoid -> (a, d) ------------

def _fold_kernel(rs_ref, rq_ref, gamma_ref, beta_ref, wt_ref, b_ref,
                 a_ref, d_ref, *, n, hw):
    rs = rs_ref[...]                        # (N, C) spatial sums of raw x
    rq = rq_ref[...]                        # (N, C) spatial sums of x^2
    gamma = gamma_ref[...]                  # (1, C) lane-dense
    beta = beta_ref[...]                    # (1, C) lane-dense

    inv_count = 1.0 / (n * hw)
    mean_c = jnp.sum(rs, axis=0, keepdims=True) * inv_count       # (1, C)
    ex2_c = jnp.sum(rq, axis=0, keepdims=True) * inv_count        # (1, C)
    var_c = ex2_c - mean_c * mean_c                               # biased (train mode)
    g = jax.lax.rsqrt(var_c + EPS) * gamma                        # (1, C)

    # pooled bn == (mean_x[n,c] - mean_c) * g + beta  (bn tensor never needed)
    pooled = (rs * (1.0 / hw) - mean_c) * g + beta                # (N, C)
    y = jnp.dot(pooled, wt_ref[...],
                preferred_element_type=jnp.float32) + b_ref[...]  # (N, Cout)
    s = jax.nn.sigmoid(y)

    a_ref[...] = s * g                                            # per-(n,c) scale
    d_ref[...] = s * (beta - mean_c * g)                          # per-(n,c) bias


# --------------- pass 2: fused scale/bias writeback -------------------------

def _apply_kernel(x_ref, a_ref, d_ref, o_ref):
    # o = x * a[row] + d[row]  (single FMA per element, lane-dense store)
    o_ref[...] = x_ref[...] * a_ref[...] + d_ref[...]


# --------------- wrapper -----------------------------------------------------

def sse_block(x, gamma, beta, conv_w, conv_b):
    """x: (N, C, H, W); conv_w: (Cout, C, 1, 1); conv_b: (Cout,) -> (N, Cout, H, W)."""
    N, C, H, W = x.shape
    Cout = conv_w.shape[0]
    assert Cout == C, "bn * sigmoid(conv(pool)) broadcast requires out_channels == in_channels"
    HW = H * W
    R = N * C

    x2 = x.reshape(R, HW).astype(jnp.float32)
    gamma2 = gamma.reshape(1, C).astype(jnp.float32)
    beta2 = beta.reshape(1, C).astype(jnp.float32)
    wt = conv_w.reshape(Cout, C).T.astype(jnp.float32)            # (C, Cout)
    b2 = conv_b.reshape(1, Cout).astype(jnp.float32)

    # ---- tile selection: x8 sublane rows, x128 lane-dense spatial tiles -----
    HW_pad = _round_up(HW, 128)
    TL = _pick_lane_tile(HW_pad)
    R8 = _round_up(R, 8)
    tr_budget = max(8, (_TILE_BYTES_TARGET // (TL * 4)) // 8 * 8)
    TR = min(R8, tr_budget)
    R_pad = _round_up(R, TR)

    if (R_pad, HW_pad) != (R, HW):
        # zero padding is stats-neutral: we divide by the true counts below.
        x2 = jnp.pad(x2, ((0, R_pad - R), (0, HW_pad - HW)))

    grid_r = R_pad // TR
    grid_l = HW_pad // TL

    # ---- pass 1: per-row sum / sum of squares -------------------------------
    row_sum, row_sq = pl.pallas_call(
        _stats_kernel,
        out_shape=(jax.ShapeDtypeStruct((R_pad, 1), jnp.float32),
                   jax.ShapeDtypeStruct((R_pad, 1), jnp.float32)),
        grid=(grid_r, grid_l),
        in_specs=[pl.BlockSpec((TR, TL), lambda i, j: (i, j))],
        out_specs=(pl.BlockSpec((TR, 1), lambda i, j: (i, 0)),
                   pl.BlockSpec((TR, 1), lambda i, j: (i, 0))),
        compiler_params=pltpu.CompilerParams(
            dimension_semantics=("parallel", "arbitrary"),
            vmem_limit_bytes=_VMEM_LIMIT),
    )(x2)

    # ---- tiny fold: batch stats + 1x1 conv + sigmoid -> per-row (a, d) ------
    rs = row_sum[:R, 0].reshape(N, C)
    rq = row_sq[:R, 0].reshape(N, C)
    a_mat, d_mat = pl.pallas_call(
        functools.partial(_fold_kernel, n=N, hw=HW),
        out_shape=(jax.ShapeDtypeStruct((N, Cout), jnp.float32),
                   jax.ShapeDtypeStruct((N, Cout), jnp.float32)),
        grid=(1,),
        in_specs=[
            pl.BlockSpec((N, C), lambda i: (0, 0)),
            pl.BlockSpec((N, C), lambda i: (0, 0)),
            pl.BlockSpec((1, C), lambda i: (0, 0)),
            pl.BlockSpec((1, C), lambda i: (0, 0)),
            pl.BlockSpec((C, Cout), lambda i: (0, 0)),
            pl.BlockSpec((1, Cout), lambda i: (0, 0)),
        ],
        out_specs=(pl.BlockSpec((N, Cout), lambda i: (0, 0)),
                   pl.BlockSpec((N, Cout), lambda i: (0, 0))),
        compiler_params=pltpu.CompilerParams(
            dimension_semantics=("arbitrary",)),
    )(rs, rq, gamma2, beta2, wt, b2)

    a_col = a_mat.reshape(R, 1)
    d_col = d_mat.reshape(R, 1)
    if R_pad != R:
        a_col = jnp.pad(a_col, ((0, R_pad - R), (0, 0)))
        d_col = jnp.pad(d_col, ((0, R_pad - R), (0, 0)))

    # ---- pass 2: o = x * a[n,c] + d[n,c] ------------------------------------
    out = pl.pallas_call(
        _apply_kernel,
        out_shape=jax.ShapeDtypeStruct((R_pad, HW_pad), jnp.float32),
        grid=(grid_r, grid_l),
        in_specs=[
            pl.BlockSpec((TR, TL), lambda i, j: (i, j)),
            pl.BlockSpec((TR, 1), lambda i, j: (i, 0)),
            pl.BlockSpec((TR, 1), lambda i, j: (i, 0)),
        ],
        out_specs=pl.BlockSpec((TR, TL), lambda i, j: (i, j)),
        compiler_params=pltpu.CompilerParams(
            dimension_semantics=("parallel", "parallel"),
            vmem_limit_bytes=_VMEM_LIMIT),
    )(x2, a_col, d_col)

    return out[:R, :HW].reshape(N, Cout, H, W)


# --------------- pure-JAX reference ------------------------------------------

def sse_block_ref(x, gamma, beta, conv_w, conv_b):
    N, C, H, W = x.shape
    Cout = conv_w.shape[0]
    mean = jnp.mean(x, axis=(0, 2, 3), keepdims=True)
    var = jnp.mean((x - mean) ** 2, axis=(0, 2, 3), keepdims=True)
    bn = (x - mean) * jax.lax.rsqrt(var + EPS) * gamma.reshape(1, C, 1, 1) \
         + beta.reshape(1, C, 1, 1)
    pooled = jnp.mean(bn, axis=(2, 3))                              # (N, C)
    y = pooled @ conv_w.reshape(Cout, C).T + conv_b                 # (N, Cout)
    s = jax.nn.sigmoid(y)
    return bn * s[:, :, None, None]


def _run_case(key, N, C, H, W):
    k_x, k_w, k_b, k_g, k_be = jax.random.split(key, 5)
    x = jax.random.normal(k_x, (N, C, H, W), dtype=jnp.float32)
    conv_w = jax.random.normal(k_w, (C, C, 1, 1), dtype=jnp.float32) * 0.1
    conv_b = jax.random.normal(k_b, (C,), dtype=jnp.float32) * 0.1
    gamma = 1.0 + 0.1 * jax.random.normal(k_g, (C,), dtype=jnp.float32)
    beta = 0.1 * jax.random.normal(k_be, (C,), dtype=jnp.float32)

    z = jax.block_until_ready(sse_block(x, gamma, beta, conv_w, conv_b))
    z_ref = sse_block_ref(x, gamma, beta, conv_w, conv_b)
    assert z.shape == (N, C, H, W)
    assert jnp.allclose(z, z_ref, atol=1e-4, rtol=1e-4), \
        f"mismatch at {(N, C, H, W)}: {jnp.max(jnp.abs(z - z_ref))}"


if __name__ == "__main__":
    key = jax.random.PRNGKey(0)
    k0, k1, k2 = jax.random.split(key, 3)

    # primary small case (aligned: HW=256, N*C=8)
    _run_case(k0, 2, 4, 16, 16)
    # ragged spatial tail (HW=196 -> padded to 256 lanes)
    _run_case(k1, 2, 4, 14, 14)
    # ragged rows and spatial (N*C=15 -> padded rows, HW=81 -> padded lanes)
    _run_case(k2, 3, 5, 9, 9)

    print("KERNEL_OK")
</pallas_src>

<mosaic_0001>
module attributes {stable_mosaic.version = 11 : i64} {
  func.func @_stats_kernel(%arg0: i32, %arg1: i32, %arg2: memref<8x256xf32, #tpu.memory_space<vmem>>, %arg3: memref<8x1xf32, #tpu.memory_space<vmem>>, %arg4: memref<8x1xf32, #tpu.memory_space<vmem>>) attributes {dimension_semantics = [#tpu.dimension_semantics<parallel>, #tpu.dimension_semantics<arbitrary>], iteration_bounds = array<i64: 1, 1>, scalar_prefetch = 0 : i64, scratch_operands = 0 : i64, tpu.core_type = #tpu.core_type<tc>, window_params = [{transform_indices = @transform_0, window_bounds = array<i64: 8, 256>}, {transform_indices = @transform_1, window_bounds = array<i64: 8, 1>}, {transform_indices = @transform_2, window_bounds = array<i64: 8, 1>}]} {
    %c0_i32 = arith.constant 0 : i32
    %0 = arith.cmpi eq, %arg1, %c0_i32 : i32
    %1 = arith.extui %0 : i1 to i32
    %c0_i32_0 = arith.constant 0 : i32
    %2 = arith.cmpi ne, %1, %c0_i32_0 : i32
    scf.if %2 {
      %cst_11 = arith.constant 0.000000e+00 : f32
      %15 = vector.broadcast %cst_11 : f32 to vector<8x1xf32>
      %c0_12 = arith.constant 0 : index
      %c0_13 = arith.constant 0 : index
      %16 = vector.load %arg3[%c0_12, %c0_13] : memref<8x1xf32, #tpu.memory_space<vmem>>, vector<8x1xf32>
      tpu.vector_store %arg3[%c0_12, %c0_13], %15 {strides = array<i32>} : memref<8x1xf32, #tpu.memory_space<vmem>>, vector<8x1xf32>,
      %cst_14 = arith.constant 0.000000e+00 : f32
      %17 = vector.broadcast %cst_14 : f32 to vector<8x1xf32>
      %c0_15 = arith.constant 0 : index
      %c0_16 = arith.constant 0 : index
      %18 = vector.load %arg4[%c0_15, %c0_16] : memref<8x1xf32, #tpu.memory_space<vmem>>, vector<8x1xf32>
      tpu.vector_store %arg4[%c0_15, %c0_16], %17 {strides = array<i32>} : memref<8x1xf32, #tpu.memory_space<vmem>>, vector<8x1xf32>,
    } else {
    }
    %c0 = arith.constant 0 : index
    %c0_1 = arith.constant 0 : index
    %3 = vector.load %arg2[%c0, %c0_1] : memref<8x256xf32, #tpu.memory_space<vmem>>, vector<8x256xf32>
    %c0_2 = arith.constant 0 : index
    %c0_3 = arith.constant 0 : index
    %4 = vector.load %arg3[%c0_2, %c0_3] : memref<8x1xf32, #tpu.memory_space<vmem>>, vector<8x1xf32>
    %cst = arith.constant dense<0.000000e+00> : vector<8xf32>
    %5 = vector.multi_reduction <add>, %3, %cst [1] : vector<8x256xf32> to vector<8xf32>
    %6 = vector.shape_cast %5 : vector<8xf32> to vector<8x1xf32>
    %7 = arith.addf %4, %6 : vector<8x1xf32>
    %c0_4 = arith.constant 0 : index
    %c0_5 = arith.constant 0 : index
    %8 = vector.load %arg3[%c0_4, %c0_5] : memref<8x1xf32, #tpu.memory_space<vmem>>, vector<8x1xf32>
    tpu.vector_store %arg3[%c0_4, %c0_5], %7 {strides = array<i32>} : memref<8x1xf32, #tpu.memory_space<vmem>>, vector<8x1xf32>,
    %c0_6 = arith.constant 0 : index
    %c0_7 = arith.constant 0 : index
    %9 = vector.load %arg4[%c0_6, %c0_7] : memref<8x1xf32, #tpu.memory_space<vmem>>, vector<8x1xf32>
    %10 = arith.mulf %3, %3 : vector<8x256xf32>
    %cst_8 = arith.constant dense<0.000000e+00> : vector<8xf32>
    %11 = vector.multi_reduction <add>, %10, %cst_8 [1] : vector<8x256xf32> to vector<8xf32>
    %12 = vector.shape_cast %11 : vector<8xf32> to vector<8x1xf32>
    %13 = arith.addf %9, %12 : vector<8x1xf32>
    %c0_9 = arith.constant 0 : index
    %c0_10 = arith.constant 0 : index
    %14 = vector.load %arg4[%c0_9, %c0_10] : memref<8x1xf32, #tpu.memory_space<vmem>>, vector<8x1xf32>
    tpu.vector_store %arg4[%c0_9, %c0_10], %13 {strides = array<i32>} : memref<8x1xf32, #tpu.memory_space<vmem>>, vector<8x1xf32>,
    return
  }
  func.func @transform_0(%arg0: i32, %arg1: i32) -> (i32, i32) {
    %c0_i32 = arith.constant 0 : i32
    return %arg0, %arg1 : i32, i32
  }
  func.func @transform_1(%arg0: i32, %arg1: i32) -> (i32, i32) {
    %c0_i32 = arith.constant 0 : i32
    %c0_i32_0 = arith.constant 0 : i32
    return %arg0, %c0_i32 : i32, i32
  }
  func.func @transform_2(%arg0: i32, %arg1: i32) -> (i32, i32) {
    %c0_i32 = arith.constant 0 : i32
    %c0_i32_0 = arith.constant 0 : i32
    return %arg0, %c0_i32 : i32, i32
  }
}

</mosaic_0001>

<bundles_post_ra>
// kernel: tpu_custom_call.1
= control target key start
LH: loop header
LB: loop body
LE: loop exit
PB: predicated region body
PF: predicated region fallthrough
CT: control target
= control target key end

     0   :  { %8 = vsyncpa [#allocation3], 0  ;;  %s81_s9 = smov [#allocation2]   ;;  %s132_s0 = inlined_call_operand.hbm [shape: f32[8,256], index: 0, kind: input, shape index: {}]   ;;  %s133_s1 = inlined_call_operand.vmem [shape: f32[8,1], index: 1, kind: output, shape index: {0}]   ;;  %s134_s2 = inlined_call_operand.vmem [shape: f32[8,1], index: 2, kind: output, shape index: {1}]  }
   0x1   :  { %s15_s10 = sshll.u32 %s81_s9, 4  ;;  %s57_s13 = scalar_lea.hbm %s132_s0, 256  ;;  %s16_s10 = int_to_ptr.vmem [resolvable:$true] %s15_s10 }
   0x2   :  { %p58_p0 = scmp.ne.s32.totalorder %s132_s0, %s57_s13  ;;  %p61_p1 = scmp.lt.u32.totalorder %s57_s13, %s132_s0 }
   0x4   :  { %p63_p2 = pnand %p61_p1, %p58_p0 }
   0x6   :  { %66 = shalt.err (!%p63_p2)
}
   0x7   :  { %s67_s18 = scalar_lea.vmem %s16_s10, 256  ;;  %p72_p4 = scmp.lt.s32.totalorder %s16_s10, %s16_s10 }
   0x8   :  { %p68_p3 = scmp.ne.s32.totalorder %s16_s10, %s67_s18  ;;  %p73_p5 = scmp.lt.s32.totalorder %s67_s18, %s67_s18 }
   0xa   :  { %p74_p6 = por %p73_p5, %p72_p4 }
   0xc   :  { %p75_p7 = pnand %p74_p6, %p68_p3 }
   0xe   :  { %78 = shalt.err (!%p75_p7)
}
   0xf   :  { %18 = dma.hbm_to_vmem [thread:$0]  %s132_s0, 256, %s16_s10, [#allocation3]  }
  0x10   :  { %79 = dma.done.wait [#allocation3], 256  }
  0x11   :  { %80 = vsyncadd [#allocation3], 4294967040  ;;  %vm26_vm0 = vcmask 7168   ;;  %v82_v0 = vmov 0.0   ;;  %v29_v1 = vld [vmem:[#allocation2] sm:$0xff]  ;;  %v30_v2 = vld [vmem:[#allocation2 + $0x8] sm:$0xff] }
  0x12   :  { %27 = vst.msk [vmem:[%s133_s1] sm:$0xff] %vm26_vm0, %v82_v0  ;;  %28 = vst.msk [vmem:[%s134_s2] sm:$0xff] %vm26_vm0, %v82_v0  ;;  %v32_v3 = vadd.f32 %v30_v2, %v29_v1  ;;  %v39_v4 = vmul.f32 %v29_v1, %v29_v1  ;;  %v40_v5 = vmul.f32 %v30_v2, %v30_v2 }
  0x14   :  { %33 = vadd.xlane.f32.xlu0 %v32_v3  ;;  %v41_v6 = vadd.f32 %v40_v5, %v39_v4 }
  0x18   :  { %42 = vadd.xlane.f32.xlu0 %v41_v6 }
  0x19   :  { %v31_v7 = vld [vmem:[%s133_s1] sm:$0xff] }
  0x1a   :  { %v38_v10 = vld [vmem:[%s134_s2] sm:$0xff] }
  0xa1   :  { %v34_v8 = vpop.xlane.xlu0 %33 }
  0xa2   :  { %v35_v9 = vadd.f32 %v34_v8, %v31_v7 }
  0xa4   :  { %37 = vst.msk [vmem:[%s133_s1] sm:$0xff] %vm26_vm0, %v35_v9 }
  0xa5   :  { %v43_v11 = vpop.xlane.xlu0 %42 }
  0xa6   :  { %v44_v12 = vadd.f32 %v43_v11, %v38_v10 }
  0xa8   :  { %45 = vst.msk [vmem:[%s134_s2] sm:$0xff] %vm26_vm0, %v44_v12 }
  0xa9   :  { %54 = vsyncpa [#allocation3], 1 }

</bundles_post_ra>
